<compile_context>
chip_gen: v7x
topology: tpu7x:2x2x1
jax: 0.10.0
libtpu: 0.0.40
codegen_flags: <defaults>
</compile_context>

<pallas_src>
import functools

import jax
import jax.numpy as jnp
from jax.experimental import pallas as pl
from jax.experimental.pallas import tpu as pltpu


def _decoder_kernel(z_ref, w1_ref, b1_ref, wf_ref, bf_ref, seg_ref, out_ref):
    # hidden = relu(z @ W1 + b1)                       (B, H)
    hidden = jnp.dot(z_ref[...], w1_ref[...], preferred_element_type=jnp.float32)
    hidden = jnp.maximum(hidden + b1_ref[...], 0.0)

    # Fused head matmul: (B, H) @ (H, out_heads*out_len) + (1, out_heads*out_len)
    logits = jnp.dot(hidden, wf_ref[...], preferred_element_type=jnp.float32)
    logits = logits + bf_ref[...]                      # (B, O)

    # Segmented (per-head) numerically-stable softmax over the lane axis.
    # Subtracting the per-row global max is mathematically identical to the
    # per-head max (any per-row constant cancels) and keeps exponents <= 0.
    m = jnp.max(logits, axis=-1, keepdims=True)        # (B, 1)
    e = jnp.exp(logits - m)                            # (B, O)
    # Per-head sums, broadcast back to every lane of that head, via one matmul
    # with the block-diagonal ones matrix seg (O, O):  denom[b, j] = sum over
    # lanes i in the same head as j of e[b, i].
    denom = jnp.dot(e, seg_ref[...], preferred_element_type=jnp.float32)
    out_ref[...] = e * pl.reciprocal(denom, approx=True)


@functools.partial(jax.jit, static_argnames=())
def decoder_forward(z, w1, b1, wh, bh):
    """z: (B, z_dim); w1: (z_dim, H); b1: (1, H);
    wh: (out_heads, H, out_len); bh: (out_heads, out_len).
    Returns stacked softmax outputs (out_heads, B, out_len)."""
    B, z_dim = z.shape
    H = w1.shape[1]
    out_heads, _, out_len = wh.shape
    O = out_heads * out_len

    # Fuse all head weights / biases onto the lane axis.
    wf = jnp.transpose(wh, (1, 0, 2)).reshape(H, O)    # (H, O)
    bf = bh.reshape(1, O)                              # (1, O)

    # Block-diagonal ones matrix marking "same head" lane pairs.
    head_id = jnp.arange(O, dtype=jnp.int32) // out_len
    seg = (head_id[:, None] == head_id[None, :]).astype(jnp.float32)  # (O, O)

    out = pl.pallas_call(
        _decoder_kernel,
        out_shape=jax.ShapeDtypeStruct((B, O), jnp.float32),
        # Single gridless invocation: every operand fits in VMEM whole.
        in_specs=[pl.BlockSpec(memory_space=pltpu.MemorySpace.VMEM)] * 6,
        out_specs=pl.BlockSpec(memory_space=pltpu.MemorySpace.VMEM),
    )(z, w1, b1, wf, bf, seg)

    # Lane-dense kernel output -> (out_heads, B, out_len) head stacking.
    return jnp.transpose(out.reshape(B, out_heads, out_len), (1, 0, 2))


def reference_forward(z, w1, b1, wh, bh):
    hidden = jax.nn.relu(z @ w1 + b1)
    logits = jnp.einsum("bh,ohl->obl", hidden, wh) + bh[:, None, :]
    return jax.nn.softmax(logits, axis=-1)


if __name__ == "__main__":
    # Small, forward-consistent shapes.
    B, z_dim, hidden_1, out_heads, out_len = 2, 8, 32, 3, 16

    key = jax.random.PRNGKey(0)
    k_z, k_w1, k_b1, k_wh, k_bh = jax.random.split(key, 5)

    # Deterministic synthetic parameters (scaled like PyTorch default init bounds).
    z = jax.random.normal(k_z, (B, z_dim), dtype=jnp.float32)
    w1 = jax.random.uniform(k_w1, (z_dim, hidden_1), dtype=jnp.float32,
                            minval=-1.0, maxval=1.0) / jnp.sqrt(z_dim)
    b1 = jax.random.uniform(k_b1, (1, hidden_1), dtype=jnp.float32,
                            minval=-1.0, maxval=1.0) / jnp.sqrt(z_dim)
    wh = jax.random.uniform(k_wh, (out_heads, hidden_1, out_len), dtype=jnp.float32,
                            minval=-1.0, maxval=1.0) / jnp.sqrt(hidden_1)
    bh = jax.random.uniform(k_bh, (out_heads, out_len), dtype=jnp.float32,
                            minval=-1.0, maxval=1.0) / jnp.sqrt(hidden_1)

    out = decoder_forward(z, w1, b1, wh, bh)
    out = jax.block_until_ready(out)

    # Match the PyTorch module's list-of-tensors return convention.
    outputs = [out[h] for h in range(out_heads)]

    ref = reference_forward(z, w1, b1, wh, bh)
    assert out.shape == (out_heads, B, out_len)
    # Tolerance loosened slightly vs. 1e-5 because the kernel uses the EUP
    # approximate reciprocal (pl.reciprocal(..., approx=True)) for the softmax
    # normalization; structural errors would be O(1e-1) and still caught.
    assert jnp.allclose(out, ref, atol=5e-3, rtol=5e-3), "mismatch vs. JAX reference"
    # Softmax rows sum to ~1 (up to approx-reciprocal error).
    assert jnp.allclose(jnp.sum(out, axis=-1), 1.0, atol=5e-3)

    print("KERNEL_OK")
</pallas_src>

<mosaic_0001>
module attributes {stable_mosaic.version = 11 : i64} {
  func.func @_decoder_kernel(%arg0: memref<2x8xf32, #tpu.memory_space<vmem>>, %arg1: memref<8x32xf32, #tpu.memory_space<vmem>>, %arg2: memref<1x32xf32, #tpu.memory_space<vmem>>, %arg3: memref<32x48xf32, #tpu.memory_space<vmem>>, %arg4: memref<1x48xf32, #tpu.memory_space<vmem>>, %arg5: memref<48x48xf32, #tpu.memory_space<vmem>>, %arg6: memref<2x48xf32, #tpu.memory_space<vmem>>) attributes {dimension_semantics = [], scalar_prefetch = 0 : i64, scratch_operands = 0 : i64, tpu.core_type = #tpu.core_type<tc>} {
    %c0 = arith.constant 0 : index
    %c0_0 = arith.constant 0 : index
    %0 = vector.load %arg0[%c0, %c0_0] : memref<2x8xf32, #tpu.memory_space<vmem>>, vector<2x8xf32>
    %c0_1 = arith.constant 0 : index
    %c0_2 = arith.constant 0 : index
    %1 = vector.load %arg1[%c0_1, %c0_2] : memref<8x32xf32, #tpu.memory_space<vmem>>, vector<8x32xf32>
    %cst = arith.constant dense<0.000000e+00> : vector<2x32xf32>
    %2 = tpu.matmul %0, %1, %cst {dimension_numbers = #tpu.dot_dimension_numbers<[1], [0], [0], [1], [0, 0, 1, 1], [], []>} : vector<2x8xf32>, vector<8x32xf32>, vector<2x32xf32> -> vector<2x32xf32>
    %c0_3 = arith.constant 0 : index
    %c0_4 = arith.constant 0 : index
    %3 = vector.load %arg2[%c0_3, %c0_4] : memref<1x32xf32, #tpu.memory_space<vmem>>, vector<1x32xf32>
    %4 = vector.broadcast %3 : vector<1x32xf32> to vector<2x32xf32>
    %5 = arith.addf %2, %4 : vector<2x32xf32>
    %cst_5 = arith.constant 0.000000e+00 : f32
    %6 = vector.broadcast %cst_5 : f32 to vector<2x32xf32>
    %7 = arith.maximumf %5, %6 : vector<2x32xf32>
    %c0_6 = arith.constant 0 : index
    %c0_7 = arith.constant 0 : index
    %8 = vector.load %arg3[%c0_6, %c0_7] : memref<32x48xf32, #tpu.memory_space<vmem>>, vector<32x48xf32>
    %cst_8 = arith.constant dense<0.000000e+00> : vector<2x48xf32>
    %9 = tpu.matmul %7, %8, %cst_8 {dimension_numbers = #tpu.dot_dimension_numbers<[1], [0], [0], [1], [0, 0, 1, 1], [], []>} : vector<2x32xf32>, vector<32x48xf32>, vector<2x48xf32> -> vector<2x48xf32>
    %c0_9 = arith.constant 0 : index
    %c0_10 = arith.constant 0 : index
    %10 = vector.load %arg4[%c0_9, %c0_10] : memref<1x48xf32, #tpu.memory_space<vmem>>, vector<1x48xf32>
    %11 = vector.broadcast %10 : vector<1x48xf32> to vector<2x48xf32>
    %12 = arith.addf %9, %11 : vector<2x48xf32>
    %cst_11 = arith.constant dense<0xFF800000> : vector<2xf32>
    %13 = vector.multi_reduction <maximumf>, %12, %cst_11 [1] : vector<2x48xf32> to vector<2xf32>
    %14 = vector.shape_cast %13 : vector<2xf32> to vector<2x1xf32>
    %15 = vector.broadcast %14 : vector<2x1xf32> to vector<2x48xf32>
    %16 = arith.subf %12, %15 : vector<2x48xf32>
    %17 = math.exp %16 : vector<2x48xf32>
    %c0_12 = arith.constant 0 : index
    %c0_13 = arith.constant 0 : index
    %18 = vector.load %arg5[%c0_12, %c0_13] : memref<48x48xf32, #tpu.memory_space<vmem>>, vector<48x48xf32>
    %cst_14 = arith.constant dense<0.000000e+00> : vector<2x48xf32>
    %19 = tpu.matmul %17, %18, %cst_14 {dimension_numbers = #tpu.dot_dimension_numbers<[1], [0], [0], [1], [0, 0, 1, 1], [], []>} : vector<2x48xf32>, vector<48x48xf32>, vector<2x48xf32> -> vector<2x48xf32>
    %20 = tpu.reciprocal %19 {approx = true} : vector<2x48xf32> -> vector<2x48xf32>
    %21 = arith.mulf %17, %20 : vector<2x48xf32>
    %c0_15 = arith.constant 0 : index
    %c0_16 = arith.constant 0 : index
    %22 = vector.load %arg6[%c0_15, %c0_16] : memref<2x48xf32, #tpu.memory_space<vmem>>, vector<2x48xf32>
    tpu.vector_store %arg6[%c0_15, %c0_16], %21 {strides = array<i32>} : memref<2x48xf32, #tpu.memory_space<vmem>>, vector<2x48xf32>,
    return
  }
}

</mosaic_0001>

<bundles_post_ra>
// kernel: decoder_forward.1
= control target key start
LH: loop header
LB: loop body
LE: loop exit
PB: predicated region body
PF: predicated region fallthrough
CT: control target
= control target key end

     0   :  { %vm32_vm0 = vcmask 64512   ;;  %v358_v0 = vmov 0.0   ;;  %vm359_vm1 = vmmov 0   ;;  %v360_v5 = vmov 0.0|0.0   ;;  %s443_s1 = inlined_call_operand.vmem [shape: f32[8,32], index: 1, kind: input, shape index: {}]   ;;  %s444_s0 = inlined_call_operand.vmem [shape: f32[2,8], index: 0, kind: input, shape index: {}]   ;;  %s445_s3 = inlined_call_operand.vmem [shape: f32[32,48], index: 3, kind: input, shape index: {}]   ;;  %s446_s2 = inlined_call_operand.vmem [shape: f32[1,32], index: 2, kind: input, shape index: {}]   ;;  %s447_s4 = inlined_call_operand.vmem [shape: f32[1,48], index: 4, kind: input, shape index: {}]   ;;  %s448_s5 = inlined_call_operand.vmem [shape: f32[48,48], index: 5, kind: input, shape index: {}]   ;;  %s449_s6 = inlined_call_operand.vmem [shape: f32[2,48], index: 6, kind: output, shape index: {}]  }
   0x1   :  { %305 = vmatprep.subr.mxu1 %v358_v0  ;;  %v24_v1 = vld [vmem:[%s443_s1] sm:$0xff]  ;;  %307 = vmatprep.mubr.msk.f32.mxu1 %vm359_vm1, %v358_v0  ;;  %v108_v4 = vld [vmem:[%s445_s3 + $0x8] sm:$0xff]  ;;  %v109_v7 = vld [vmem:[%s445_s3 + $0x10] sm:$0xff]  ;;  %vm118_vm2 = vcmask 261120   ;;  %vm192_vm3 = vcmask 386048   ;;  %vm205_vm4 = vcmask 392192  }
   0x2   :  { %v23_v2 = vld [vmem:[%s444_s0] sm:$0x3]  ;;  %306 = vmatpush3.msra.mxu1 %v24_v1  ;;  %342 = vmatprep.subr.bf16.mxu0 %v360_v5  ;;  %v110_v8 = vld [vmem:[%s445_s3 + $0x18] sm:$0xff]  ;;  %v200_v21 = vld [vmem:[%s448_s5 + $0x8] sm:$0xff] }
   0x3   :  { %v107_v3 = vld [vmem:[%s445_s3] sm:$0xff]  ;;  %308 = vmatmul.mubr.msk.f32.vlgmr.msra.gmra.mrb[0].mxu1 %vm32_vm0, %v23_v2  ;;  %336 = vmatprep.subr.bf16.mxu1 %v360_v5  ;;  %v340_v9 = vpack.c.bf16 %v110_v8, %v109_v7  ;;  %v201_v23 = vld [vmem:[%s448_s5 + $0x10] sm:$0xff]  ;;  %v202_v24 = vld [vmem:[%s448_s5 + $0x18] sm:$0xff] }
   0x4   :  { %v337_v6 = vpack.c.bf16 %v108_v4, %v107_v3  ;;  %318 = vmatprep.mubr.msk.f32.mxu1 %vm359_vm1, %v358_v0  ;;  %333 = vmatprep.mubr.msk.f32.mxu0 %vm359_vm1, %v358_v0  ;;  %v286_v10 = vld [vmem:[%s446_s2] ss:$0 sm:$0xff]  ;;  %v346_v25 = vpack.c.bf16 %v202_v24, %v201_v23  ;;  %v204_v27 = vld [vmem:[%s448_s5 + $0x28] sm:$0xff] }
   0x5   :  { %v288_v15 = vld [vmem:[%s447_s4] ss:$0 sm:$0xff] }
   0x6   :  { %338 = vmatpush3.bf16.msra.mxu1 %v337_v6  ;;  %v199_v20 = vld [vmem:[%s448_s5] sm:$0xff] }
   0x7   :  { %339 = vmatprep.subr.bf16.mxu1 %v360_v5  ;;  %v343_v22 = vpack.c.bf16 %v200_v21, %v199_v20  ;;  %v203_v26 = vld [vmem:[%s448_s5 + $0x20] sm:$0xff] }
   0x8   :  { %v349_v28 = vpack.c.bf16 %v204_v27, %v203_v26 }
   0x9   :  { %344 = vmatpush3.bf16.msra.mxu0 %v343_v22 }
   0xa   :  { %341 = vmatpush3.bf16.msra.mxu1 %v340_v9  ;;  %345 = vmatprep.subr.bf16.mxu0 %v360_v5 }
   0xd   :  { %347 = vmatpush3.bf16.msra.mxu0 %v346_v25 }
   0xe   :  { %348 = vmatprep.subr.bf16.mxu0 %v360_v5 }
  0x11   :  { %350 = vmatpush3.bf16.msra.mxu0 %v349_v28 }
  0xd6   :  { %v102_v11 = vpop.f32.mrb[0].mxu1 }
  0xd7   :  { %v103_v12 = vadd.f32 %v286_v10, %v102_v11  ;;  %v309_v13 = vpop.f32.mrb[1].mxu1 }
  0xd9   :  { %v106_v14 = vmax.f32 %v103_v12, 0.0 }
  0xdb   :  { %319 = vmatmul.mubr.msk.f32.vlgmr.msra.gmra.mrb[2].mxu1 %vm118_vm2, %v106_v14 }
 0x1ae   :  { %v188_v16 = vpop.f32.mrb[2].mxu1 }
 0x1af   :  { %v189_v17 = vadd.f32 %v288_v15, %v188_v16  ;;  %v320_v18 = vpop.f32.mrb[3].mxu1 }
 0x1b1   :  { %v193_v19 = vsel %vm192_vm3, %v189_v17, -inf }
 0x1b2   :  { %194 = vmax.xlane.f32.xlu0 %v193_v19 }
 0x23f   :  { %v195_v29 = vpop.xlane.xlu0 %194 }
 0x240   :  { %v196_v30 = vsub.f32 %v189_v17, %v195_v29 }
 0x242   :  { %v197_v31 = vmul.f32 1.442695, %v196_v30 }
 0x244   :  { %354 = vpow2.f32 %v197_v31 }
 0x24e   :  { %v355_v32 = vpop.eup %354 }
 0x24f   :  { %334 = vmatmul.mubr.msk.f32.vlgmr.msra.gmra.mrb[0].mxu0 %vm205_vm4, %v355_v32 }
 0x322   :  { %v275_v33 = vpop.f32.mrb[0].mxu0 }
 0x323   :  { %356 = vrcp.f32 %v275_v33  ;;  %v335_v34 = vpop.f32.mrb[1].mxu0 }
 0x32d   :  { %v357_v35 = vpop.eup %356 }
 0x32e   :  { %v280_v36 = vmul.f32 %v357_v35, %v355_v32 }
 0x330   :  { %281 = vst.msk [vmem:[%s449_s6] sm:$0x3] %vm192_vm3, %v280_v36 }

</bundles_post_ra>
